<compile_context>
chip_gen: v6e
topology: v6e:2x2x1
jax: 0.10.0
libtpu: 0.0.40
codegen_flags: <defaults>
</compile_context>

<pallas_src>
import functools

import jax
import jax.numpy as jnp
from jax.experimental import pallas as pl
from jax.experimental.pallas import tpu as pltpu

_SQRT1_2 = 0.7071067811865476


def _gelu_exact(x):
    # matches torch.nn.GELU() default (erf-based)
    return 0.5 * x * (1.0 + jax.lax.erf(x * _SQRT1_2))


def _tap_masks(H, W):
    """(9, H*W) f32 {0,1} boundary masks, taps ordered (dy, dx) row-major."""
    HW = H * W
    lane = jnp.arange(HW, dtype=jnp.int32)
    row = lane // W
    col = lane % W
    masks = []
    for dy in (-1, 0, 1):
        for dx in (-1, 0, 1):
            m = jnp.ones((HW,), jnp.bool_)
            if dy < 0:
                m = m & (row >= -dy)
            elif dy > 0:
                m = m & (row < H - dy)
            if dx < 0:
                m = m & (col >= -dx)
            elif dx > 0:
                m = m & (col < W - dx)
            masks.append(m)
    return jnp.stack(masks, axis=0).astype(jnp.float32)


def scm_kernel(x_ref, masks_ref, w1_ref, b1_ref, w2_ref, b2_ref, w3_ref,
               b3_ref, w4_ref, b4_ref, gamma_ref, beta_ref, o_ref, *,
               H, W, eps):
    HW = H * W

    def im2col(a):
        # a: (C, HW) -> (9*C, HW); zero-padded 3x3 neighborhoods via lane
        # rolls (XLU) + precomputed boundary masks (one vmul per tap).
        parts = []
        t = 0
        for dy in (-1, 0, 1):
            for dx in (-1, 0, 1):
                off = dy * W + dx
                shifted = a if off == 0 else pltpu.roll(a, (-off) % HW, axis=1)
                if not (dy == 0 and dx == 0):
                    shifted = shifted * masks_ref[t:t + 1, :]
                parts.append(shifted)
                t += 1
        return jnp.concatenate(parts, axis=0)

    x = x_ref[0]                                                  # (3, HW)

    # ---- conv1: 3x3, 3 -> C1 (single matmul, K=27), bias, GELU ----
    a1 = _gelu_exact(
        jnp.dot(w1_ref[...], im2col(x), preferred_element_type=jnp.float32)
        + b1_ref[...])                                            # (C1, HW)

    # ---- conv2: 1x1, C1 -> C2, bias, GELU ----
    a2 = _gelu_exact(
        jnp.dot(w2_ref[...], a1, preferred_element_type=jnp.float32)
        + b2_ref[...])                                            # (C2, HW)

    # ---- conv3: 3x3, C2 -> C2 (single matmul, K=9*C2), bias, GELU ----
    a3 = _gelu_exact(
        jnp.dot(w3_ref[...], im2col(a2), preferred_element_type=jnp.float32)
        + b3_ref[...])                                            # (C2, HW)

    # ---- conv4: 1x1, C2 -> C4, bias (no activation) ----
    y = (jnp.dot(w4_ref[...], a3, preferred_element_type=jnp.float32)
         + b4_ref[...])                                           # (C4, HW)

    # ---- InstanceNorm2d(C4, affine): single pass, affine folded into FMA ----
    inv_hw = jnp.float32(1.0 / HW)
    s1 = jnp.sum(y, axis=1, keepdims=True)                        # (C4, 1)
    s2 = jnp.sum(y * y, axis=1, keepdims=True)                    # (C4, 1)
    mean = s1 * inv_hw
    var = s2 * inv_hw - mean * mean                               # biased var
    scale = gamma_ref[...] * jax.lax.rsqrt(var + eps)             # (C4, 1)
    shift = beta_ref[...] - mean * scale
    o_ref[0] = (y * scale + shift).astype(o_ref.dtype)


def scm_forward(x_nchw, params):
    B, Cin, H, W = x_nchw.shape
    assert Cin == 3
    HW = H * W
    C1 = params["w1"].shape[-1]
    C2 = params["w2"].shape[-1]
    C4 = params["w4"].shape[-1]

    # Channels -> sublanes, flattened H*W -> lanes (lane-dense).
    x = x_nchw.reshape(B, Cin, HW)

    # Precomputed boundary masks for the 9 taps (shared by both 3x3 convs).
    masks = _tap_masks(H, W)                                      # (9, HW)

    # Kernel-format params: weights (Cout, K) for out = W @ act; biases (C, 1).
    w1_k = params["w1"].reshape(9 * Cin, C1).T          # (C1, 27)
    w2_k = params["w2"].T                               # (C2, C1)
    w3_k = params["w3"].reshape(9 * C2, C2).T           # (C2, 9*C2)
    w4_k = params["w4"].T                               # (C4, C2)
    b1_k = params["b1"][:, None]
    b2_k = params["b2"][:, None]
    b3_k = params["b3"][:, None]
    b4_k = params["b4"][:, None]
    gamma_k = params["gamma"][:, None]
    beta_k = params["beta"][:, None]

    kernel = functools.partial(scm_kernel, H=H, W=W, eps=1e-5)

    def full(shape):
        return pl.BlockSpec(shape, lambda b: (0,) * len(shape))

    in_specs = [
        pl.BlockSpec((1, Cin, HW), lambda b: (b, 0, 0)),   # x
        full(masks.shape),                                 # tap masks
        full(w1_k.shape), full(b1_k.shape),
        full(w2_k.shape), full(b2_k.shape),
        full(w3_k.shape), full(b3_k.shape),
        full(w4_k.shape), full(b4_k.shape),
        full(gamma_k.shape), full(beta_k.shape),
    ]

    # Scoped-VMEM budget sized to the real block footprint (with slack).
    est = 4 * (2 * (Cin + C4) * HW                              # in/out (x2 buf)
               + 9 * HW                                          # tap masks
               + (9 * Cin + C1 + C2 + 9 * C2 + C2 + 2 * C4) * HW  # temporaries
               + 2 * (C1 * 27 + C2 * C1 + C2 * 9 * C2 + C4 * C2
                      + C1 + 2 * C2 + 3 * C4))                  # params
    vmem_limit = int(min(max(4 * est, 32 * 1024 * 1024), 64 * 1024 * 1024))

    out = pl.pallas_call(
        kernel,
        out_shape=jax.ShapeDtypeStruct((B, C4, HW), jnp.float32),
        grid_spec=pltpu.PrefetchScalarGridSpec(
            num_scalar_prefetch=0,
            grid=(B,),
            in_specs=in_specs,
            out_specs=pl.BlockSpec((1, C4, HW), lambda b: (b, 0, 0)),
        ),
        compiler_params=pltpu.CompilerParams(
            dimension_semantics=("parallel",),
            vmem_limit_bytes=vmem_limit),
    )(x, masks, w1_k, b1_k, w2_k, b2_k, w3_k, b3_k, w4_k, b4_k,
      gamma_k, beta_k)

    # Output is already (B, C, H*W) -> NCHW is a free reshape (no transpose).
    return out.reshape(B, C4, H, W)


def ref_forward(x_nchw, params, eps=1e-5):
    """Pure-JAX reference mirroring the PyTorch SCM forward."""
    x = jnp.transpose(x_nchw, (0, 2, 3, 1))  # NHWC

    def conv3x3(a, w, b):
        H, W = a.shape[1], a.shape[2]
        ap = jnp.pad(a, ((0, 0), (1, 1), (1, 1), (0, 0)))
        out = 0.0
        for dy in range(3):
            for dx in range(3):
                out = out + jnp.einsum("bhwc,co->bhwo",
                                       ap[:, dy:dy + H, dx:dx + W, :], w[dy, dx])
        return out + b

    a1 = _gelu_exact(conv3x3(x, params["w1"], params["b1"]))
    a2 = _gelu_exact(jnp.einsum("bhwc,co->bhwo", a1, params["w2"]) + params["b2"])
    a3 = _gelu_exact(conv3x3(a2, params["w3"], params["b3"]))
    y = jnp.einsum("bhwc,co->bhwo", a3, params["w4"]) + params["b4"]
    mean = jnp.mean(y, axis=(1, 2), keepdims=True)
    var = jnp.mean((y - mean) ** 2, axis=(1, 2), keepdims=True)
    yn = (y - mean) * jax.lax.rsqrt(var + eps)
    out = yn * params["gamma"] + params["beta"]
    return jnp.transpose(out, (0, 3, 1, 2))


def init_params(key, out_plane):
    C1, C2, C4 = out_plane // 4, out_plane // 2, out_plane
    ks = jax.random.split(key, 10)
    s = 0.1
    return {
        # conv weights stored HWIO (kh, kw, cin, cout); biases as (cout,)
        "w1": s * jax.random.normal(ks[0], (3, 3, 3, C1), jnp.float32),
        "b1": s * jax.random.normal(ks[1], (C1,), jnp.float32),
        "w2": s * jax.random.normal(ks[2], (C1, C2), jnp.float32),
        "b2": s * jax.random.normal(ks[3], (C2,), jnp.float32),
        "w3": s * jax.random.normal(ks[4], (3, 3, C2, C2), jnp.float32),
        "b3": s * jax.random.normal(ks[5], (C2,), jnp.float32),
        "w4": s * jax.random.normal(ks[6], (C2, C4), jnp.float32),
        "b4": s * jax.random.normal(ks[7], (C4,), jnp.float32),
        # InstanceNorm2d affine params (perturbed to exercise the affine path)
        "gamma": 1.0 + 0.05 * jax.random.normal(ks[8], (C4,), jnp.float32),
        "beta": 0.05 * jax.random.normal(ks[9], (C4,), jnp.float32),
    }


if __name__ == "__main__":
    B, H, W = 2, 16, 16
    out_plane = 16  # -> channels 4 -> 8 -> 8 -> 16

    key = jax.random.PRNGKey(0)
    kx, kp = jax.random.split(key)
    x = jax.random.normal(kx, (B, 3, H, W), jnp.float32)  # NCHW, like PyTorch
    params = init_params(kp, out_plane)

    out = jax.block_until_ready(scm_forward(x, params))
    assert out.shape == (B, out_plane, H, W)

    ref = ref_forward(x, params)
    max_err = float(jnp.max(jnp.abs(out - ref)))
    if max_err > 1e-3:
        raise AssertionError(f"Pallas SCM mismatch vs reference: {max_err}")

    print("KERNEL_OK")
</pallas_src>

<mosaic_0001>
module attributes {stable_mosaic.version = 11 : i64} {
  func.func @scm_kernel(%arg0: i32, %arg1: memref<1x3x256xf32, #tpu.memory_space<vmem>>, %arg2: memref<9x256xf32, #tpu.memory_space<vmem>>, %arg3: memref<4x27xf32, #tpu.memory_space<vmem>>, %arg4: memref<4x1xf32, #tpu.memory_space<vmem>>, %arg5: memref<8x4xf32, #tpu.memory_space<vmem>>, %arg6: memref<8x1xf32, #tpu.memory_space<vmem>>, %arg7: memref<8x72xf32, #tpu.memory_space<vmem>>, %arg8: memref<8x1xf32, #tpu.memory_space<vmem>>, %arg9: memref<16x8xf32, #tpu.memory_space<vmem>>, %arg10: memref<16x1xf32, #tpu.memory_space<vmem>>, %arg11: memref<16x1xf32, #tpu.memory_space<vmem>>, %arg12: memref<16x1xf32, #tpu.memory_space<vmem>>, %arg13: memref<1x16x256xf32, #tpu.memory_space<vmem>>) attributes {dimension_semantics = [#tpu.dimension_semantics<parallel>], iteration_bounds = array<i64: 2>, scalar_prefetch = 0 : i64, scratch_operands = 0 : i64, tpu.core_type = #tpu.core_type<tc>, window_params = [{transform_indices = @transform_0, window_bounds = array<i64: 1, 3, 256>}, {pipeline_mode = #tpu.pipeline_mode<synchronous>, transform_indices = @transform_1, window_bounds = array<i64: 9, 256>}, {pipeline_mode = #tpu.pipeline_mode<synchronous>, transform_indices = @transform_2, window_bounds = array<i64: 4, 27>}, {pipeline_mode = #tpu.pipeline_mode<synchronous>, transform_indices = @transform_3, window_bounds = array<i64: 4, 1>}, {pipeline_mode = #tpu.pipeline_mode<synchronous>, transform_indices = @transform_4, window_bounds = array<i64: 8, 4>}, {pipeline_mode = #tpu.pipeline_mode<synchronous>, transform_indices = @transform_5, window_bounds = array<i64: 8, 1>}, {pipeline_mode = #tpu.pipeline_mode<synchronous>, transform_indices = @transform_6, window_bounds = array<i64: 8, 72>}, {pipeline_mode = #tpu.pipeline_mode<synchronous>, transform_indices = @transform_7, window_bounds = array<i64: 8, 1>}, {pipeline_mode = #tpu.pipeline_mode<synchronous>, transform_indices = @transform_8, window_bounds = array<i64: 16, 8>}, {pipeline_mode = #tpu.pipeline_mode<synchronous>, transform_indices = @transform_9, window_bounds = array<i64: 16, 1>}, {pipeline_mode = #tpu.pipeline_mode<synchronous>, transform_indices = @transform_10, window_bounds = array<i64: 16, 1>}, {pipeline_mode = #tpu.pipeline_mode<synchronous>, transform_indices = @transform_11, window_bounds = array<i64: 16, 1>}, {transform_indices = @transform_12, window_bounds = array<i64: 1, 16, 256>}]} {
    %c0 = arith.constant 0 : index
    %c0_0 = arith.constant 0 : index
    %c0_1 = arith.constant 0 : index
    %0 = vector.load %arg1[%c0, %c0_0, %c0_1] : memref<1x3x256xf32, #tpu.memory_space<vmem>>, vector<1x3x256xf32>
    %1 = vector.shape_cast %0 : vector<1x3x256xf32> to vector<3x256xf32>
    %c0_2 = arith.constant 0 : index
    %c0_3 = arith.constant 0 : index
    %2 = vector.load %arg3[%c0_2, %c0_3] : memref<4x27xf32, #tpu.memory_space<vmem>>, vector<4x27xf32>
    %c17_i32 = arith.constant 17 : i32
    %3 = tpu.dynamic_rotate %1 by %c17_i32 dim 1 : vector<3x256xf32>, i32 -> vector<3x256xf32>
    %c0_4 = arith.constant 0 : index
    %c0_5 = arith.constant 0 : index
    %4 = vector.load %arg2[%c0_4, %c0_5] : memref<9x256xf32, #tpu.memory_space<vmem>>, vector<1x256xf32>
    %5 = vector.broadcast %4 : vector<1x256xf32> to vector<3x256xf32>
    %6 = arith.mulf %3, %5 : vector<3x256xf32>
    %c16_i32 = arith.constant 16 : i32
    %7 = tpu.dynamic_rotate %1 by %c16_i32 dim 1 : vector<3x256xf32>, i32 -> vector<3x256xf32>
    %c1 = arith.constant 1 : index
    %c0_6 = arith.constant 0 : index
    %8 = vector.load %arg2[%c1, %c0_6] : memref<9x256xf32, #tpu.memory_space<vmem>>, vector<1x256xf32>
    %9 = vector.broadcast %8 : vector<1x256xf32> to vector<3x256xf32>
    %10 = arith.mulf %7, %9 : vector<3x256xf32>
    %c15_i32 = arith.constant 15 : i32
    %11 = tpu.dynamic_rotate %1 by %c15_i32 dim 1 : vector<3x256xf32>, i32 -> vector<3x256xf32>
    %c2 = arith.constant 2 : index
    %c0_7 = arith.constant 0 : index
    %12 = vector.load %arg2[%c2, %c0_7] : memref<9x256xf32, #tpu.memory_space<vmem>>, vector<1x256xf32>
    %13 = vector.broadcast %12 : vector<1x256xf32> to vector<3x256xf32>
    %14 = arith.mulf %11, %13 : vector<3x256xf32>
    %c1_i32 = arith.constant 1 : i32
    %15 = tpu.dynamic_rotate %1 by %c1_i32 dim 1 : vector<3x256xf32>, i32 -> vector<3x256xf32>
    %c3 = arith.constant 3 : index
    %c0_8 = arith.constant 0 : index
    %16 = vector.load %arg2[%c3, %c0_8] : memref<9x256xf32, #tpu.memory_space<vmem>>, vector<1x256xf32>
    %17 = vector.broadcast %16 : vector<1x256xf32> to vector<3x256xf32>
    %18 = arith.mulf %15, %17 : vector<3x256xf32>
    %c255_i32 = arith.constant 255 : i32
    %19 = tpu.dynamic_rotate %1 by %c255_i32 dim 1 : vector<3x256xf32>, i32 -> vector<3x256xf32>
    %c5 = arith.constant 5 : index
    %c0_9 = arith.constant 0 : index
    %20 = vector.load %arg2[%c5, %c0_9] : memref<9x256xf32, #tpu.memory_space<vmem>>, vector<1x256xf32>
    %21 = vector.broadcast %20 : vector<1x256xf32> to vector<3x256xf32>
    %22 = arith.mulf %19, %21 : vector<3x256xf32>
    %c241_i32 = arith.constant 241 : i32
    %23 = tpu.dynamic_rotate %1 by %c241_i32 dim 1 : vector<3x256xf32>, i32 -> vector<3x256xf32>
    %c6 = arith.constant 6 : index
    %c0_10 = arith.constant 0 : index
    %24 = vector.load %arg2[%c6, %c0_10] : memref<9x256xf32, #tpu.memory_space<vmem>>, vector<1x256xf32>
    %25 = vector.broadcast %24 : vector<1x256xf32> to vector<3x256xf32>
    %26 = arith.mulf %23, %25 : vector<3x256xf32>
    %c240_i32 = arith.constant 240 : i32
    %27 = tpu.dynamic_rotate %1 by %c240_i32 dim 1 : vector<3x256xf32>, i32 -> vector<3x256xf32>
    %c7 = arith.constant 7 : index
    %c0_11 = arith.constant 0 : index
    %28 = vector.load %arg2[%c7, %c0_11] : memref<9x256xf32, #tpu.memory_space<vmem>>, vector<1x256xf32>
    %29 = vector.broadcast %28 : vector<1x256xf32> to vector<3x256xf32>
    %30 = arith.mulf %27, %29 : vector<3x256xf32>
    %c239_i32 = arith.constant 239 : i32
    %31 = tpu.dynamic_rotate %1 by %c239_i32 dim 1 : vector<3x256xf32>, i32 -> vector<3x256xf32>
    %c8 = arith.constant 8 : index
    %c0_12 = arith.constant 0 : index
    %32 = vector.load %arg2[%c8, %c0_12] : memref<9x256xf32, #tpu.memory_space<vmem>>, vector<1x256xf32>
    %33 = vector.broadcast %32 : vector<1x256xf32> to vector<3x256xf32>
    %34 = arith.mulf %31, %33 : vector<3x256xf32>
    %35 = tpu.concatenate %6, %10, %14, %18, %1, %22, %26, %30, %34 in 0 : vector<3x256xf32>, vector<3x256xf32>, vector<3x256xf32>, vector<3x256xf32>, vector<3x256xf32>, vector<3x256xf32>, vector<3x256xf32>, vector<3x256xf32>, vector<3x256xf32> -> vector<27x256xf32>
    %cst = arith.constant dense<0.000000e+00> : vector<4x256xf32>
    %36 = tpu.matmul %2, %35, %cst {dimension_numbers = #tpu.dot_dimension_numbers<[1], [0], [0], [1], [0, 0, 1, 1], [], []>} : vector<4x27xf32>, vector<27x256xf32>, vector<4x256xf32> -> vector<4x256xf32>
    %c0_13 = arith.constant 0 : index
    %c0_14 = arith.constant 0 : index
    %37 = vector.load %arg4[%c0_13, %c0_14] : memref<4x1xf32, #tpu.memory_space<vmem>>, vector<4x1xf32>
    %38 = vector.broadcast %37 : vector<4x1xf32> to vector<4x256xf32>
    %39 = arith.addf %36, %38 : vector<4x256xf32>
    %cst_15 = arith.constant 5.000000e-01 : f32
    %40 = vector.broadcast %cst_15 : f32 to vector<4x256xf32>
    %41 = arith.mulf %40, %39 : vector<4x256xf32>
    %cst_16 = arith.constant 0.707106769 : f32
    %42 = vector.broadcast %cst_16 : f32 to vector<4x256xf32>
    %43 = arith.mulf %39, %42 : vector<4x256xf32>
    %44 = math.erf %43 : vector<4x256xf32>
    %cst_17 = arith.constant 1.000000e+00 : f32
    %45 = vector.broadcast %cst_17 : f32 to vector<4x256xf32>
    %46 = arith.addf %45, %44 : vector<4x256xf32>
    %47 = arith.mulf %41, %46 : vector<4x256xf32>
    %c0_18 = arith.constant 0 : index
    %c0_19 = arith.constant 0 : index
    %48 = vector.load %arg5[%c0_18, %c0_19] : memref<8x4xf32, #tpu.memory_space<vmem>>, vector<8x4xf32>
    %cst_20 = arith.constant dense<0.000000e+00> : vector<8x256xf32>
    %49 = tpu.matmul %48, %47, %cst_20 {dimension_numbers = #tpu.dot_dimension_numbers<[1], [0], [0], [1], [0, 0, 1, 1], [], []>} : vector<8x4xf32>, vector<4x256xf32>, vector<8x256xf32> -> vector<8x256xf32>
    %c0_21 = arith.constant 0 : index
    %c0_22 = arith.constant 0 : index
    %50 = vector.load %arg6[%c0_21, %c0_22] : memref<8x1xf32, #tpu.memory_space<vmem>>, vector<8x1xf32>
    %51 = vector.broadcast %50 : vector<8x1xf32> to vector<8x256xf32>
    %52 = arith.addf %49, %51 : vector<8x256xf32>
    %cst_23 = arith.constant 5.000000e-01 : f32
    %53 = vector.broadcast %cst_23 : f32 to vector<8x256xf32>
    %54 = arith.mulf %53, %52 : vector<8x256xf32>
    %cst_24 = arith.constant 0.707106769 : f32
    %55 = vector.broadcast %cst_24 : f32 to vector<8x256xf32>
    %56 = arith.mulf %52, %55 : vector<8x256xf32>
    %57 = math.erf %56 : vector<8x256xf32>
    %cst_25 = arith.constant 1.000000e+00 : f32
    %58 = vector.broadcast %cst_25 : f32 to vector<8x256xf32>
    %59 = arith.addf %58, %57 : vector<8x256xf32>
    %60 = arith.mulf %54, %59 : vector<8x256xf32>
    %c0_26 = arith.constant 0 : index
    %c0_27 = arith.constant 0 : index
    %61 = vector.load %arg7[%c0_26, %c0_27] : memref<8x72xf32, #tpu.memory_space<vmem>>, vector<8x72xf32>
    %c17_i32_28 = arith.constant 17 : i32
    %62 = tpu.dynamic_rotate %60 by %c17_i32_28 dim 1 : vector<8x256xf32>, i32 -> vector<8x256xf32>
    %c0_29 = arith.constant 0 : index
    %c0_30 = arith.constant 0 : index
    %63 = vector.load %arg2[%c0_29, %c0_30] : memref<9x256xf32, #tpu.memory_space<vmem>>, vector<1x256xf32>
    %64 = vector.broadcast %63 : vector<1x256xf32> to vector<8x256xf32>
    %65 = arith.mulf %62, %64 : vector<8x256xf32>
    %c16_i32_31 = arith.constant 16 : i32
    %66 = tpu.dynamic_rotate %60 by %c16_i32_31 dim 1 : vector<8x256xf32>, i32 -> vector<8x256xf32>
    %c1_32 = arith.constant 1 : index
    %c0_33 = arith.constant 0 : index
    %67 = vector.load %arg2[%c1_32, %c0_33] : memref<9x256xf32, #tpu.memory_space<vmem>>, vector<1x256xf32>
    %68 = vector.broadcast %67 : vector<1x256xf32> to vector<8x256xf32>
    %69 = arith.mulf %66, %68 : vector<8x256xf32>
    %c15_i32_34 = arith.constant 15 : i32
    %70 = tpu.dynamic_rotate %60 by %c15_i32_34 dim 1 : vector<8x256xf32>, i32 -> vector<8x256xf32>
    %c2_35 = arith.constant 2 : index
    %c0_36 = arith.constant 0 : index
    %71 = vector.load %arg2[%c2_35, %c0_36] : memref<9x256xf32, #tpu.memory_space<vmem>>, vector<1x256xf32>
    %72 = vector.broadcast %71 : vector<1x256xf32> to vector<8x256xf32>
    %73 = arith.mulf %70, %72 : vector<8x256xf32>
    %c1_i32_37 = arith.constant 1 : i32
    %74 = tpu.dynamic_rotate %60 by %c1_i32_37 dim 1 : vector<8x256xf32>, i32 -> vector<8x256xf32>
    %c3_38 = arith.constant 3 : index
    %c0_39 = arith.constant 0 : index
    %75 = vector.load %arg2[%c3_38, %c0_39] : memref<9x256xf32, #tpu.memory_space<vmem>>, vector<1x256xf32>
    %76 = vector.broadcast %75 : vector<1x256xf32> to vector<8x256xf32>
    %77 = arith.mulf %74, %76 : vector<8x256xf32>
    %c255_i32_40 = arith.constant 255 : i32
    %78 = tpu.dynamic_rotate %60 by %c255_i32_40 dim 1 : vector<8x256xf32>, i32 -> vector<8x256xf32>
    %c5_41 = arith.constant 5 : index
    %c0_42 = arith.constant 0 : index
    %79 = vector.load %arg2[%c5_41, %c0_42] : memref<9x256xf32, #tpu.memory_space<vmem>>, vector<1x256xf32>
    %80 = vector.broadcast %79 : vector<1x256xf32> to vector<8x256xf32>
    %81 = arith.mulf %78, %80 : vector<8x256xf32>
    %c241_i32_43 = arith.constant 241 : i32
    %82 = tpu.dynamic_rotate %60 by %c241_i32_43 dim 1 : vector<8x256xf32>, i32 -> vector<8x256xf32>
    %c6_44 = arith.constant 6 : index
    %c0_45 = arith.constant 0 : index
    %83 = vector.load %arg2[%c6_44, %c0_45] : memref<9x256xf32, #tpu.memory_space<vmem>>, vector<1x256xf32>
    %84 = vector.broadcast %83 : vector<1x256xf32> to vector<8x256xf32>
    %85 = arith.mulf %82, %84 : vector<8x256xf32>
    %c240_i32_46 = arith.constant 240 : i32
    %86 = tpu.dynamic_rotate %60 by %c240_i32_46 dim 1 : vector<8x256xf32>, i32 -> vector<8x256xf32>
    %c7_47 = arith.constant 7 : index
    %c0_48 = arith.constant 0 : index
    %87 = vector.load %arg2[%c7_47, %c0_48] : memref<9x256xf32, #tpu.memory_space<vmem>>, vector<1x256xf32>
    %88 = vector.broadcast %87 : vector<1x256xf32> to vector<8x256xf32>
    %89 = arith.mulf %86, %88 : vector<8x256xf32>
    %c239_i32_49 = arith.constant 239 : i32
    %90 = tpu.dynamic_rotate %60 by %c239_i32_49 dim 1 : vector<8x256xf32>, i32 -> vector<8x256xf32>
    %c8_50 = arith.constant 8 : index
    %c0_51 = arith.constant 0 : index
    %91 = vector.load %arg2[%c8_50, %c0_51] : memref<9x256xf32, #tpu.memory_space<vmem>>, vector<1x256xf32>
    %92 = vector.broadcast %91 : vector<1x256xf32> to vector<8x256xf32>
    %93 = arith.mulf %90, %92 : vector<8x256xf32>
    %94 = tpu.concatenate %65, %69, %73, %77, %60, %81, %85, %89, %93 in 0 : vector<8x256xf32>, vector<8x256xf32>, vector<8x256xf32>, vector<8x256xf32>, vector<8x256xf32>, vector<8x256xf32>, vector<8x256xf32>, vector<8x256xf32>, vector<8x256xf32> -> vector<72x256xf32>
    %cst_52 = arith.constant dense<0.000000e+00> : vector<8x256xf32>
    %95 = tpu.matmul %61, %94, %cst_52 {dimension_numbers = #tpu.dot_dimension_numbers<[1], [0], [0], [1], [0, 0, 1, 1], [], []>} : vector<8x72xf32>, vector<72x256xf32>, vector<8x256xf32> -> vector<8x256xf32>
    %c0_53 = arith.constant 0 : index
    %c0_54 = arith.constant 0 : index
    %96 = vector.load %arg8[%c0_53, %c0_54] : memref<8x1xf32, #tpu.memory_space<vmem>>, vector<8x1xf32>
    %97 = vector.broadcast %96 : vector<8x1xf32> to vector<8x256xf32>
    %98 = arith.addf %95, %97 : vector<8x256xf32>
    %cst_55 = arith.constant 5.000000e-01 : f32
    %99 = vector.broadcast %cst_55 : f32 to vector<8x256xf32>
    %100 = arith.mulf %99, %98 : vector<8x256xf32>
    %cst_56 = arith.constant 0.707106769 : f32
    %101 = vector.broadcast %cst_56 : f32 to vector<8x256xf32>
    %102 = arith.mulf %98, %101 : vector<8x256xf32>
    %103 = math.erf %102 : vector<8x256xf32>
    %cst_57 = arith.constant 1.000000e+00 : f32
    %104 = vector.broadcast %cst_57 : f32 to vector<8x256xf32>
    %105 = arith.addf %104, %103 : vector<8x256xf32>
    %106 = arith.mulf %100, %105 : vector<8x256xf32>
    %c0_58 = arith.constant 0 : index
    %c0_59 = arith.constant 0 : index
    %107 = vector.load %arg9[%c0_58, %c0_59] : memref<16x8xf32, #tpu.memory_space<vmem>>, vector<16x8xf32>
    %cst_60 = arith.constant dense<0.000000e+00> : vector<16x256xf32>
    %108 = tpu.matmul %107, %106, %cst_60 {dimension_numbers = #tpu.dot_dimension_numbers<[1], [0], [0], [1], [0, 0, 1, 1], [], []>} : vector<16x8xf32>, vector<8x256xf32>, vector<16x256xf32> -> vector<16x256xf32>
    %c0_61 = arith.constant 0 : index
    %c0_62 = arith.constant 0 : index
    %109 = vector.load %arg10[%c0_61, %c0_62] : memref<16x1xf32, #tpu.memory_space<vmem>>, vector<16x1xf32>
    %110 = vector.broadcast %109 : vector<16x1xf32> to vector<16x256xf32>
    %111 = arith.addf %108, %110 : vector<16x256xf32>
    %cst_63 = arith.constant dense<0.000000e+00> : vector<16xf32>
    %112 = vector.multi_reduction <add>, %111, %cst_63 [1] : vector<16x256xf32> to vector<16xf32>
    %113 = vector.shape_cast %112 : vector<16xf32> to vector<16x1xf32>
    %114 = arith.mulf %111, %111 : vector<16x256xf32>
    %cst_64 = arith.constant dense<0.000000e+00> : vector<16xf32>
    %115 = vector.multi_reduction <add>, %114, %cst_64 [1] : vector<16x256xf32> to vector<16xf32>
    %116 = vector.shape_cast %115 : vector<16xf32> to vector<16x1xf32>
    %cst_65 = arith.constant 3.906250e-03 : f32
    %117 = vector.broadcast %cst_65 : f32 to vector<16x1xf32>
    %118 = arith.mulf %113, %117 : vector<16x1xf32>
    %cst_66 = arith.constant 3.906250e-03 : f32
    %119 = vector.broadcast %cst_66 : f32 to vector<16x1xf32>
    %120 = arith.mulf %116, %119 : vector<16x1xf32>
    %121 = arith.mulf %118, %118 : vector<16x1xf32>
    %122 = arith.subf %120, %121 : vector<16x1xf32>
    %c0_67 = arith.constant 0 : index
    %c0_68 = arith.constant 0 : index
    %123 = vector.load %arg11[%c0_67, %c0_68] : memref<16x1xf32, #tpu.memory_space<vmem>>, vector<16x1xf32>
    %cst_69 = arith.constant 9.99999974E-6 : f32
    %124 = vector.broadcast %cst_69 : f32 to vector<16x1xf32>
    %125 = arith.addf %122, %124 : vector<16x1xf32>
    %126 = math.rsqrt %125 : vector<16x1xf32>
    %127 = arith.mulf %123, %126 : vector<16x1xf32>
    %c0_70 = arith.constant 0 : index
    %c0_71 = arith.constant 0 : index
    %128 = vector.load %arg12[%c0_70, %c0_71] : memref<16x1xf32, #tpu.memory_space<vmem>>, vector<16x1xf32>
    %129 = arith.mulf %118, %127 : vector<16x1xf32>
    %130 = arith.subf %128, %129 : vector<16x1xf32>
    %131 = vector.broadcast %127 : vector<16x1xf32> to vector<16x256xf32>
    %132 = arith.mulf %111, %131 : vector<16x256xf32>
    %133 = vector.broadcast %130 : vector<16x1xf32> to vector<16x256xf32>
    %134 = arith.addf %132, %133 : vector<16x256xf32>
    %c0_72 = arith.constant 0 : index
    %c0_73 = arith.constant 0 : index
    %c0_74 = arith.constant 0 : index
    %135 = vector.load %arg13[%c0_72, %c0_73, %c0_74] : memref<1x16x256xf32, #tpu.memory_space<vmem>>, vector<1x16x256xf32>
    %136 = vector.shape_cast %135 : vector<1x16x256xf32> to vector<16x256xf32>
    %137 = vector.shape_cast %134 : vector<16x256xf32> to vector<1x16x256xf32>
    tpu.vector_store %arg13[%c0_72, %c0_73, %c0_74], %137 {strides = array<i32>} : memref<1x16x256xf32, #tpu.memory_space<vmem>>, vector<1x16x256xf32>,
    return
  }
  func.func @transform_0(%arg0: i32) -> (i32, i32, i32) {
    %c0_i32 = arith.constant 0 : i32
    %c0_i32_0 = arith.constant 0 : i32
    %c0_i32_1 = arith.constant 0 : i32
    return %arg0, %c0_i32, %c0_i32_0 : i32, i32, i32
  }
  func.func @transform_1(%arg0: i32) -> (i32, i32) {
    %c0_i32 = arith.constant 0 : i32
    %c0_i32_0 = arith.constant 0 : i32
    %c0_i32_1 = arith.constant 0 : i32
    return %c0_i32, %c0_i32_0 : i32, i32
  }
  func.func @transform_2(%arg0: i32) -> (i32, i32) {
    %c0_i32 = arith.constant 0 : i32
    %c0_i32_0 = arith.constant 0 : i32
    %c0_i32_1 = arith.constant 0 : i32
    return %c0_i32, %c0_i32_0 : i32, i32
  }
  func.func @transform_3(%arg0: i32) -> (i32, i32) {
    %c0_i32 = arith.constant 0 : i32
    %c0_i32_0 = arith.constant 0 : i32
    %c0_i32_1 = arith.constant 0 : i32
    return %c0_i32, %c0_i32_0 : i32, i32
  }
  func.func @transform_4(%arg0: i32) -> (i32, i32) {
    %c0_i32 = arith.constant 0 : i32
    %c0_i32_0 = arith.constant 0 : i32
    %c0_i32_1 = arith.constant 0 : i32
    return %c0_i32, %c0_i32_0 : i32, i32
  }
  func.func @transform_5(%arg0: i32) -> (i32, i32) {
    %c0_i32 = arith.constant 0 : i32
    %c0_i32_0 = arith.constant 0 : i32
    %c0_i32_1 = arith.constant 0 : i32
    return %c0_i32, %c0_i32_0 : i32, i32
  }
  func.func @transform_6(%arg0: i32) -> (i32, i32) {
    %c0_i32 = arith.constant 0 : i32
    %c0_i32_0 = arith.constant 0 : i32
    %c0_i32_1 = arith.constant 0 : i32
    return %c0_i32, %c0_i32_0 : i32, i32
  }
  func.func @transform_7(%arg0: i32) -> (i32, i32) {
    %c0_i32 = arith.constant 0 : i32
    %c0_i32_0 = arith.constant 0 : i32
    %c0_i32_1 = arith.constant 0 : i32
    return %c0_i32, %c0_i32_0 : i32, i32
  }
  func.func @transform_8(%arg0: i32) -> (i32, i32) {
    %c0_i32 = arith.constant 0 : i32
    %c0_i32_0 = arith.constant 0 : i32
    %c0_i32_1 = arith.constant 0 : i32
    return %c0_i32, %c0_i32_0 : i32, i32
  }
  func.func @transform_9(%arg0: i32) -> (i32, i32) {
    %c0_i32 = arith.constant 0 : i32
    %c0_i32_0 = arith.constant 0 : i32
    %c0_i32_1 = arith.constant 0 : i32
    return %c0_i32, %c0_i32_0 : i32, i32
  }
  func.func @transform_10(%arg0: i32) -> (i32, i32) {
    %c0_i32 = arith.constant 0 : i32
    %c0_i32_0 = arith.constant 0 : i32
    %c0_i32_1 = arith.constant 0 : i32
    return %c0_i32, %c0_i32_0 : i32, i32
  }
  func.func @transform_11(%arg0: i32) -> (i32, i32) {
    %c0_i32 = arith.constant 0 : i32
    %c0_i32_0 = arith.constant 0 : i32
    %c0_i32_1 = arith.constant 0 : i32
    return %c0_i32, %c0_i32_0 : i32, i32
  }
  func.func @transform_12(%arg0: i32) -> (i32, i32, i32) {
    %c0_i32 = arith.constant 0 : i32
    %c0_i32_0 = arith.constant 0 : i32
    %c0_i32_1 = arith.constant 0 : i32
    return %arg0, %c0_i32, %c0_i32_0 : i32, i32, i32
  }
}

</mosaic_0001>

<bundles_post_ra>
// kernel: tpu_custom_call.1
= control target key start
LH: loop header
LB: loop body
LE: loop exit
PB: predicated region body
PF: predicated region fallthrough
CT: control target
= control target key end

     0   :  { %s1902_s0 = inlined_call_operand.vmem [shape: f32[2,3,256], index: 0, kind: input, shape index: {}]   ;;  %s1903_s1 = inlined_call_operand.vmem [shape: f32[9,256], index: 1, kind: input, shape index: {}]   ;;  %s1904_s2 = inlined_call_operand.vmem [shape: f32[4,27], index: 2, kind: input, shape index: {}]   ;;  %s1905_s3 = inlined_call_operand.vmem [shape: f32[4,1], index: 3, kind: input, shape index: {}]   ;;  %s1906_s4 = inlined_call_operand.vmem [shape: f32[8,4], index: 4, kind: input, shape index: {}]   ;;  %s1907_s5 = inlined_call_operand.vmem [shape: f32[8,1], index: 5, kind: input, shape index: {}]   ;;  %s1908_s6 = inlined_call_operand.vmem [shape: f32[8,72], index: 6, kind: input, shape index: {}]   ;;  %s1909_s7 = inlined_call_operand.vmem [shape: f32[8,1], index: 7, kind: input, shape index: {}]   ;;  %s1910_s8 = inlined_call_operand.vmem [shape: f32[16,8], index: 8, kind: input, shape index: {}]   ;;  %s1911_s9 = inlined_call_operand.vmem [shape: f32[16,1], index: 9, kind: input, shape index: {}]   ;;  %s1912_s10 = inlined_call_operand.vmem [shape: f32[16,1], index: 10, kind: input, shape index: {}]   ;;  %s1913_s11 = inlined_call_operand.vmem [shape: f32[16,1], index: 11, kind: input, shape index: {}]   ;;  %s1914_s12 = inlined_call_operand.hbm [shape: f32[2,16,256], index: 12, kind: output, shape index: {}]  }
   0x1   :  { %1929 = sst [smem:[#allocation5_spill]] %s1902_s0 }
   0x2   :  { %1930 = sst [smem:[#allocation6_spill]] %s1903_s1 }
   0x3   :  { %1931 = sst [smem:[#allocation7_spill]] %s1904_s2 }
   0x4   :  { %17 = vsyncpa [#allocation3], 0 }
   0x5   :  { %19 = vsyncpa [#allocation3 + $0x1], 0  ;;  %s1487_s21 = smov 0   ;;  %s1489_s22 = smov 0  }
   0x6   :  { %s1491_s23 = smov 0   ;;  %s1493_s24 = smov 0  }
   0x7 LB: > { %s1508_s25 = sadd.s32 4294967295, %s1408_s24   ;;  %s1248_s26 = sadd.s32 4294967294, %s1408_s24   ;;  %s1408_s24 = sphi %s1493_s24, %s1947_s24   ;;  %s1404_s23 = sphi %s1491_s23, %s1946_s23   ;;  %s1400_s22 = sphi %s1489_s22, %s1945_s22   ;;  %s1396_s21 = sphi %s1487_s21, %s1944_s21  }
   0x8   : > { %s1512_s27 = sadd.s32 1, %s1408_s24   ;;  %s289_s28 = sadd.s32 1, %s1404_s23 }
   0x9   : > { %s286_s29 = ssub.s32 %s1408_s24, %s1512_s27  ;;  %p299_p0 = scmp.ne.s32.totalorder %s1404_s23, %s1400_s22 }
   0xa   : > { %p287_p1 = scmp.eq.s32.totalorder %s286_s29, 0  ;;  %p300_p2 = scmp.eq.s32.totalorder %s1508_s25, 1 }
   0xb   : > { %p305_p3 = scmp.ne.s32.totalorder %s1400_s22, %s1396_s21  ;;  %p306_p4 = scmp.eq.s32.totalorder %s1248_s26, 1 }
   0xc   : > { %s1523_s30 = scalar_select %p287_p1, %s1404_s23, %s289_s28  }
   0xd   : > { %p1525_p5 = por %p300_p2, %p299_p0  ;;  %p1529_p6 = por %p306_p4, %p305_p3 }
   0xe   : > { %p1251_p7 = scmp.ge.s32.totalorder %s1408_s24, 1  ;;  %p365_p8 = scmp.lt.s32.totalorder %s1408_s24, 3 }
  0x10   : > { %p366_p9 = pnand %p1251_p7, %p365_p8 }
  0x11   : > { %p407_p10 = scmp.lt.s32.totalorder (!%p366_p9), %s1508_s25, 1  ;;  %s1934_s0 = sld [smem:[#allocation5_spill]] (!%p366_p9) }
  0x12   : > { %369 = sbr.rel (%p366_p9) target bundleno = 1492 (0x5d4), region = 68  ;;  %s1925_s20 = smov (!%p366_p9), 113  }
  0x13   : > { %s1923_s26 = smov (!%p366_p9), 127   ;;  %s1915_s28 = smov (!%p366_p9), 15  }
  0x14   : > { %s1919_s29 = smov (!%p366_p9), 1   ;;  %s1917_s17 = smov (!%p366_p9), 16  }
  0x15   : > { %s1921_s18 = smov (!%p366_p9), 17   ;;  %s1935_s1 = sld [smem:[#allocation6_spill]] (!%p366_p9) }
  0x16   : > { %s1936_s2 = sld [smem:[#allocation7_spill]] (!%p366_p9) }
  0x17   : > { %s408_s15 = scalar_select %p407_p10, %s1508_s25, 1  ;;  %v1416_v2 = vmov 0.0   ;;  %v1417_v3 = vmov 0   ;;  %v653_v4 = vld [vmem:[%s1905_s3] sm:$0xf]  ;;  %v421_v5 = vlaneseq  ;;  %vm638_vm5 = vcmask 1040384  }
  0x18   : > { %733 = vmatprep.mubr.f32.mxu0 %v1416_v2  ;;  %831 = vmatprep.mubr.f32.mxu1 %v1416_v2  ;;  %vm647_vm6 = vcmask 1041408   ;;  %vm641_vm7 = vcmask 1043456   ;;  %vm650_vm9 = vcmask 1044480   ;;  %vm632_vm10 = vcmask 1042432  }
  0x19   : > { %s1276_s16 = sshll.u32 %s408_s15, 3  ;;  %s1927_s15 = smov 112   ;;  %1328 = vset.pattern.permute.xlu0 %v1417_v3  ;;  %1329 = vset.pattern.permute.xlu1 %v1417_v3  ;;  %v429_v8 = vshrl.u32 %v421_v5, 7  ;;  %v1573_v9 = vand.u32 127, %v421_v5  ;;  %vm644_vm12 = vcmask 1046528   ;;  %vm635_vm14 = vcmask 1045504  }
  0x1a   : > { %s411_s19 = scalar_lea.vmem %s1934_s0, %s1276_s16  ;;  %s1415_s16 = smov 111   ;;  %vm659_vm15 = vcmask 220160  }
  0x1b   : > { %v1540_v0 = vld [vmem:[%s411_s19] sm:$0x77]  ;;  %v1575_v11 = vsub.s32 0, %v429_v8  ;;  %v1577_v13 = vsub.s32 1, %v429_v8  ;;  %vm532_vm0 = vcmp.lt.s32.totalorder %v1573_v9, 113  ;;  %vm466_vm1 = vcmp.lt.s32.totalorder %v1573_v9, 15 }
  0x1c   : > { %528 = vrot.lane.b32.xlu1 %v1540_v0, %s1925_s20  ;;  %506 = vrot.lane.b32.xlu0 %v1540_v0, %s1923_s26  ;;  %v415_v1 = vcombine.high %v1540_v0, %v1540_v0  ;;  %v1259_v14 = vld [vmem:[%s1935_s1 + $0x6] ss:$8 sm:$0x3]  ;;  %v1256_v15 = vld [vmem:[%s1935_s1 + $0x2] ss:$8 sm:$0x3]  ;;  %v612_v32 = vcombine.low %v1540_v0, %v1540_v0 }
  0x1d   : > { %v1258_v16 = vld [vmem:[%s1935_s1 + $0x5] ss:$8 sm:$0x3]  ;;  %v1257_v17 = vld [vmem:[%s1935_s1 + $0x3] ss:$8 sm:$0x3]  ;;  %v1593_v18 = vrot.slane %v1259_v14, %v1575_v11  ;;  %v1602_v22 = vrot.slane %v1259_v14, %v1577_v13  ;;  %v1605_v23 = vrot.slane %v1256_v15, %v1575_v11  ;;  %v1608_v24 = vrot.slane %v1256_v15, %v1577_v13 }
  0x1e   : > { %vm510_vm2 = vcmp.lt.s32.totalorder %v1573_v9, 127  ;;  %vm488_vm3 = vcmp.lt.s32.totalorder %v1573_v9, 1  ;;  %v1260_v21 = vld [vmem:[%s1935_s1 + $0x7] ss:$8 sm:$0x3]  ;;  %v1611_v25 = vrot.slane %v1258_v16, %v1575_v11  ;;  %v1614_v26 = vrot.slane %v1258_v16, %v1577_v13  ;;  %s1938_s19 = smov 113  }
  0x1f   : > { %v1617_v27 = vrot.slane %v1257_v17, %v1575_v11  ;;  %v1620_v28 = vrot.slane %v1257_v17, %v1577_v13  ;;  %vm554_vm4 = vcmp.lt.s32.totalorder %v1573_v9, 112  ;;  %v1624_v29 = vrot.slane %v1260_v21, %v1575_v11  ;;  %v1261_v31 = vld [vmem:[%s1935_s1 + $0x10] ss:$8 sm:$0x3]  ;;  %s1420_s0 = smov [#allocation2]  }
  0x20   : > { %462 = vrot.lane.b32.xlu0 %v1540_v0, %s1915_s28  ;;  %530 = vrot.lane.b32.xlu1 %v415_v1, %s1925_s20  ;;  %v1627_v30 = vrot.slane %v1260_v21, %v1577_v13  ;;  %vm576_vm8 = vcmp.lt.s32.totalorder %v1573_v9, 111  ;;  %v1654_v45 = vrot.slane %v1261_v31, %v1575_v11  ;;  %v1661_v48 = vrot.slane %v1261_v31, %v1577_v13  ;;  %v1255_v55 = vld [vmem:[%s1935_s1 + $0x1] ss:$8 sm:$0x3]  ;;  %s1942_s20 = smov 16  }
  0x21   : > { %vm444_vm11 = vcmp.lt.s32.totalorder %v1573_v9, 16  ;;  %v1684_v3 = vrot.slane %v1255_v55, %v1577_v13  ;;  %v426_v17 = vld [vmem:[%s1935_s1] ss:$8 sm:$0x3]  ;;  %vm423_vm13 = vcmp.lt.s32.totalorder %v1573_v9, 17  ;;  %s1352_s1 = sshll.u32 %s1420_s0, 4  ;;  %s1353_s1 = int_to_ptr.vmem [resolvable:$false] %s1352_s1 }
  0x24   : > { %464 = vrot.lane.b32.xlu1 %v415_v1, %s1915_s28  ;;  %508 = vrot.lane.b32.xlu0 %v415_v1, %s1923_s26  ;;  %s1937_s28 = smov 112   ;;  %s1940_s26 = smov 1  }
  0x28   : > { %486 = vrot.lane.b32.xlu1 %v415_v1, %s1919_s29  ;;  %484 = vrot.lane.b32.xlu0 %v1540_v0, %s1919_s29  ;;  %s1939_s29 = smov 127  }
  0x2c   : > { %552 = vrot.lane.b32.xlu1 %v415_v1, %s1927_s15  ;;  %550 = vrot.lane.b32.xlu0 %v1540_v0, %s1927_s15  ;;  %s1943_s15 = smov 17  }
  0x30   : > { %574 = vrot.lane.b32.xlu1 %v415_v1, %s1415_s16  ;;  %572 = vrot.lane.b32.xlu0 %v1540_v0, %s1415_s16 }
  0x34   : > { %442 = vrot.lane.b32.xlu1 %v415_v1, %s1917_s17  ;;  %440 = vrot.lane.b32.xlu0 %v1540_v0, %s1917_s17  ;;  %s1277_s17 = sshll.u32 %s1508_s25, 9 }
  0x38   : > { %419 = vrot.lane.b32.xlu1 %v415_v1, %s1921_s18  ;;  %417 = vrot.lane.b32.xlu0 %v1540_v0, %s1921_s18  ;;  %v1681_v1 = vrot.slane %v1255_v55, %v1575_v11 }
  0x3c   : > { %656 = vperm.xlu0 %1328, %v653_v4  }
  0x8e   : > { %v529_v6 = vpop.permute.xlu1 %528  ;;  %v507_v7 = vpop.permute.xlu0 %506 }
  0x92   : > { %v463_v10 = vpop.permute.xlu0 %462  ;;  %v531_v12 = vpop.permute.xlu1 %530 }
  0x93   : > { %v533_v33 = vsel %vm532_vm0, %v529_v6, %v531_v12  ;;  %v534_v34 = vsel %vm532_vm0, %v531_v12, %v529_v6 }
  0x94   : > { %v548_v46 = vmul.f32 %v1593_v18, %v533_v33  ;;  %v549_v49 = vmul.f32 %v1602_v22, %v534_v34 }
  0x96   : > { %v465_v19 = vpop.permute.xlu1 %464  ;;  %v509_v20 = vpop.permute.xlu0 %508  ;;  %v622_v62 = vrot.slane %v548_v46, 6  ;;  %v623_v4 = vrot.slane %v549_v49, 6  ;;  %v1721_v46 = vrot.slane %v426_v17, %v1577_v13 }
  0x97   : > { %v467_v35 = vsel %vm466_vm1, %v463_v10, %v465_v19  ;;  %v468_v36 = vsel %vm466_vm1, %v465_v19, %v463_v10  ;;  %v511_v39 = vsel %vm510_vm2, %v507_v7, %v509_v20  ;;  %v512_v40 = vsel %vm510_vm2, %v509_v20, %v507_v7 }
  0x98   : > { %v1658_v47 = vmul.f32 %v1608_v24, %v467_v35  ;;  %v1665_v50 = vmul.f32 %v1605_v23, %v468_v36  ;;  %v526_v51 = vmul.f32 %v1611_v25, %v511_v39  ;;  %v527_v52 = vmul.f32 %v1614_v26, %v512_v40 }
  0x9a   : > { %v487_v37 = vpop.permute.xlu1 %486  ;;  %v485_v38 = vpop.permute.xlu0 %484  ;;  %v603_v63 = vrot.slane %v1658_v47, 2  ;;  %v602_v5 = vrot.slane %v1665_v50, 2  ;;  %v616_v6 = vrot.slane %v526_v51, 1  ;;  %v617_v7 = vrot.slane %v527_v52, 1 }
  0x9b   : > { %v489_v41 = vsel %vm488_vm3, %v485_v38, %v487_v37  ;;  %v490_v42 = vsel %vm488_vm3, %v487_v37, %v485_v38  ;;  %v1705_v38 = vrot.slane %v426_v17, %v1575_v11 }
  0x9c   : > { %v504_v43 = vmul.f32 %v1617_v27, %v490_v42  ;;  %v505_v44 = vmul.f32 %v1620_v28, %v489_v41  ;;  %v649_v35 = vsel %vm647_vm6, %v617_v7, %v623_v4  ;;  %v648_v36 = vsel %vm647_vm6, %v616_v6, %v622_v62 }
  0x9e   : > { %v553_v53 = vpop.permute.xlu1 %552  ;;  %v551_v54 = vpop.permute.xlu0 %550  ;;  %v609_v56 = vrot.slane %v505_v44, 7  ;;  %v608_v59 = vrot.slane %v504_v43, 7 }
  0x9f   : > { %v555_v57 = vsel %vm554_vm4, %v551_v54, %v553_v53  ;;  %v556_v58 = vsel %vm554_vm4, %v553_v53, %v551_v54 }
  0xa0   : > { %v570_v60 = vmul.f32 %v1624_v29, %v555_v57  ;;  %v571_v61 = vmul.f32 %v1627_v30, %v556_v58  ;;  %v640_v16 = vsel %vm638_vm5, %v603_v63, %v609_v56  ;;  %v639_v31 = vsel %vm638_vm5, %v602_v5, %v608_v59  ;;  %v413_v59 = vld [vmem:[%s1936_s2] sm:$0xf]  ;;  %s1354_s2 = scalar_lea.vmem %s1353_s1, 1024 }
  0xa1   : > { %v643_v37 = vsel %vm641_vm7, %v640_v16, %v1540_v0  ;;  %v642_v42 = vsel %vm641_vm7, %v639_v31, %v612_v32  ;;  %vm757_vm5 = vcmask 31744  }
  0xa2   : > { %v575_v8 = vpop.permute.xlu1 %574  ;;  %v573_v10 = vpop.permute.xlu0 %572  ;;  %v629_v12 = vrot.slane %v571_v61, 3  ;;  %v628_v19 = vrot.slane %v570_v60, 3  ;;  %v646_v47 = vsel %vm644_vm12, %v643_v37, %v617_v7  ;;  %v645_v0 = vsel %vm644_vm12, %v642_v42, %v616_v6  ;;  %v751_v60 = vld [vmem:[%s1907_s5] sm:$0xff] }
  0xa3   : > { %v577_v14 = vsel %vm576_vm8, %v573_v10, %v575_v8  ;;  %v578_v15 = vsel %vm576_vm8, %v575_v8, %v573_v10  ;;  %754 = vperm.xlu1 %1329, %v751_v60  }
  0xa4   : > { %v592_v20 = vmul.f32 %v1654_v45, %v577_v14  ;;  %v593_v21 = vmul.f32 %v1661_v48, %v578_v15  ;;  %v652_v41 = vsel %vm650_vm9, %v649_v35, %v629_v12  ;;  %v651_v44 = vsel %vm650_vm9, %v648_v36, %v628_v19 }
  0xa6   : > { %v443_v33 = vpop.permute.xlu1 %442  ;;  %1262 = vmatprep.subr.msk.mxu0 %vm632_vm10, %v593_v21  ;;  %v441_v34 = vpop.permute.xlu0 %440 }
  0xa7   : > { %v445_v39 = vsel %vm444_vm11, %v441_v34, %v443_v33  ;;  %v446_v40 = vsel %vm444_vm11, %v443_v33, %v441_v34  ;;  %1263 = vmatpush1.msk.msra.mxu0 %vm632_vm10, %v592_v20  ;;  %v750_v20 = vld [vmem:[%s1906_s4] sm:$0xff] }
  0xa8   : > { %v460_v43 = vmul.f32 %v1681_v1, %v446_v40  ;;  %v461_v11 = vmul.f32 %v1684_v3, %v445_v39  ;;  %695 = vmatprep.subr.mxu0 %v652_v41 }
  0xa9   : > { %696 = vmatpush1.msra.mxu0 %v651_v44 }
  0xaa   : > { %v420_v49 = vpop.permute.xlu1 %419  ;;  %697 = vmatprep.subr.mxu0 %v646_v47  ;;  %v418_v50 = vpop.permute.xlu0 %417  ;;  %v596_v52 = vrot.slane %v460_v43, 5  ;;  %v597_v53 = vrot.slane %v461_v11, 5 }
  0xab   : > { %v424_v32 = vsel %vm423_vm13, %v418_v50, %v420_v49  ;;  %v425_v51 = vsel %vm423_vm13, %v420_v49, %v418_v50  ;;  %698 = vmatpush1.msra.mxu0 %v645_v0  ;;  %v913_v49 = vld [vmem:[%s1909_s7] sm:$0xff]  ;;  %v1007_v0 = vld [vmem:[%s1911_s9 + $0x8] sm:$0xff] }
  0xac   : > { %v438_v13 = vmul.f32 %v1705_v38, %v425_v51  ;;  %v439_v54 = vmul.f32 %v1721_v46, %v424_v32  ;;  %v1006_v50 = vld [vmem:[%s1911_s9] sm:$0xff] }
  0xae   : > { %v634_v55 = vsel %vm632_vm10, %v439_v54, %v597_v53  ;;  %v633_v56 = vsel %vm632_vm10, %v438_v13, %v596_v52 }
  0xaf   : > { %v637_v57 = vsel %vm635_vm14, %v634_v55, %v603_v63  ;;  %v636_v58 = vsel %vm635_vm14, %v633_v56, %v602_v5 }
  0xb0   : > { %699 = vmatprep.subr.mxu0 %v637_v57 }
  0xb1   : > { %700 = vmatpush1.msra.mxu0 %v636_v58 }
  0xb2   : > { %1264 = vmatmul.mubr.msk.f32.vlgmr.msra.gmra.mxu0 %vm659_vm15, %v413_v59 }
  0xb3   : > { %1089 = vmatprep.mubr.f32.mxu0 %v1416_v2 }
  0xb7   : > { %v657_v61 = vpop.permute.xlu0 %656 }
 0x11e   : > { %v755_v21 = vpop.permute.xlu1 %754 }
 0x172   : > { %v735_v62 = vpop.f32.mrf.mxu0 }
 0x173   : > { %v736_v4 = vadd.f32 %v735_v62, %v657_v61 }
 0x174   : > { %v737_v63 = vpop.f32.mrf.mxu0 }
 0x175   : > { %v742_v5 = vmul.f32 0.70710677, %v736_v4  ;;  %v738_v6 = vadd.f32 %v737_v63, %v657_v61  ;;  %v740_v16 = vmul.f32 0.5, %v736_v4 }
 0x177   : > { %1332 = verf.f32 %v742_v5  ;;  %v743_v7 = vmul.f32 0.70710677, %v738_v6  ;;  %v741_v14 = vmul.f32 0.5, %v738_v6 }
 0x179   : > { %1334 = verf.f32 %v743_v7 }
 0x184   : > { %v1333_v8 = vpop.eup %1332 }
 0x185   : > { %v746_v12 = vadd.f32 1.0, %v1333_v8 }
 0x186   : > { %v1335_v10 = vpop.eup %1334 }
 0x187   : > { %v747_v15 = vadd.f32 1.0, %v1335_v10  ;;  %v748_v19 = vmul.f32 %v746_v12, %v740_v16 }
 0x189   : > { %v749_v17 = vmul.f32 %v747_v15, %v741_v14 }
 0x18b   : > { %1265 = vmatprep.subr.msk.mxu1 %vm641_vm7, %v749_v17 }
 0x18c   : > { %1266 = vmatpush1.msk.msra.mxu1 %vm641_vm7, %v748_v19 }
 0x18d   : > { %1267 = vmatmul.mubr.msk.f32.vlgmr.msra.gmra.mxu1 %vm757_vm5, %v750_v20 }
 0x18e   : > { %987 = vmatprep.mubr.f32.mxu1 %v1416_v2 }
 0x24d   : > { %v833_v31 = vpop.f32.mrf.mxu1 }
 0x24e   : > { %v834_v33 = vadd.f32 %v833_v31, %v755_v21 }
 0x24f   : > { %v835_v34 = vpop.f32.mrf.mxu1 }
 0x250   : > { %v840_v35 = vmul.f32 0.70710677, %v834_v33  ;;  %v836_v36 = vadd.f32 %v835_v34, %v755_v21  ;;  %v838_v40 = vmul.f32 0.5, %v834_v33 }
 0x252   : > { %1336 = verf.f32 %v840_v35  ;;  %v841_v37 = vmul.f32 0.70710677, %v836_v36  ;;  %v839_v11 = vmul.f32 0.5, %v836_v36 }
 0x254   : > { %1338 = verf.f32 %v841_v37 }
 0x25f   : > { %v1337_v39 = vpop.eup %1336 }
 0x260   : > { %v844_v41 = vadd.f32 1.0, %v1337_v39 }
 0x261   : > { %v1339_v42 = vpop.eup %1338 }
 0x262   : > { %v1746_v43 = vmul.f32 %v844_v41, %v838_v40  ;;  %v845_v44 = vadd.f32 1.0, %v1339_v42 }
 0x264   : > { %v847_v47 = vmul.f32 %v845_v44, %v839_v11  ;;  %905 = vrot.lane.b32.xlu1 %v1746_v43, %s1415_s16 }
 0x266   : > { %907 = vrot.lane.b32.xlu0 %v847_v47, %s1415_s16  ;;  %s1941_s16 = smov 15  }
 0x268   : > { %897 = vrot.lane.b32.xlu1 %v1746_v43, %s1937_s28 }
 0x26a   : > { %899 = vrot.lane.b32.xlu0 %v847_v47, %s1937_s28 }
 0x26c   : > { %889 = vrot.lane.b32.xlu1 %v1746_v43, %s1938_s19 }
 0x26e   : > { %891 = vrot.lane.b32.xlu0 %v847_v47, %s1938_s19  ;;  %s1859_s19 = scalar_lea.hbm %s1914_s12, %s1277_s17 }
 0x270   : > { %881 = vrot.lane.b32.xlu1 %v1746_v43, %s1939_s29 }
 0x272   : > { %883 = vrot.lane.b32.xlu0 %v847_v47, %s1939_s29  ;;  %s404_s29 = sand.u32 1, %s1400_s22  }
 0x273   : > { %s1861_s25 = scalar_lea.sflag [#allocation3], %s404_s29 }
 0x274   : > { %873 = vrot.lane.b32.xlu1 %v1746_v43, %s1940_s26 }
 0x276   : > { %875 = vrot.lane.b32.xlu0 %v847_v47, %s1940_s26  ;;  %s1252_s26 = sshll.u32 %s404_s29, 5 }
 0x278   : > { %865 = vrot.lane.b32.xlu1 %v1746_v43, %s1941_s16 }
 0x27a   : > { %867 = vrot.lane.b32.xlu0 %v847_v47, %s1941_s16  ;;  %s406_s16 = scalar_lea.vmem [#allocation2], %s1252_s26 }
 0x27c   : > { %857 = vrot.lane.b32.xlu1 %v1746_v43, %s1942_s20 }
 0x27e   : > { %859 = vrot.lane.b32.xlu0 %v847_v47, %s1942_s20 }
 0x280   : > { %849 = vrot.lane.b32.xlu1 %v1746_v43, %s1943_s15 }
 0x282   : > { %851 = vrot.lane.b32.xlu0 %v847_v47, %s1943_s15  ;;  %s1186_s15 = sshll.u32 %s406_s16, 4  ;;  %s1854_s15 = int_to_ptr.vmem [resolvable:$true] %s1186_s15 }
 0x283   : > { %s1348_s26 = scalar_lea.vmem %s1854_s15, 512  ;;  %p1355_p0 = scmp.lt.s32.totalorder %s1854_s15, %s1353_s1 }
 0x284   : > { %916 = vperm.xlu1 %1329, %v913_v49   ;;  %p1349_p11 = scmp.ne.s32.totalorder %s1854_s15, %s1348_s26  ;;  %p1356_p1 = scmp.lt.s32.totalorder %s1354_s2, %s1348_s26 }
 0x286   : > { %1010 = vperm.xlu0 %1328, %v1006_v50   ;;  %p1350_p12 = pnand %p1349_p11, %p1525_p5  ;;  %p1357_p2 = por %p1356_p1, %p1355_p0 }
 0x288   : > { %1015 = vperm.xlu1 %1329, %v1007_v0   ;;  %p1351_p13 = pneg %p1350_p12 }
 0x28a   : > { %p1358_p3 = pnand %p1357_p2, %p1351_p13 }
 0x2d6   : > { %v906_v32 = vpop.permute.xlu1 %905 }
 0x2d8   : > { %v908_v51 = vpop.permute.xlu0 %907 }
 0x2d9   : > { %v909_v52 = vsel %vm576_vm8, %v906_v32, %v908_v51  ;;  %v910_v53 = vsel %vm576_vm8, %v908_v51, %v906_v32  ;;  %v1004_v51 = vld [vmem:[%s1910_s8] sm:$0xff] }
 0x2da   : > { %v911_v13 = vmul.f32 %v909_v52, %v1654_v45  ;;  %v912_v54 = vmul.f32 %v910_v53, %v1661_v48  ;;  %v898_v55 = vpop.permute.xlu1 %897  ;;  %v1005_v52 = vld [vmem:[%s1910_s8 + $0x8] sm:$0xff] }
 0x2dc   : > { %v900_v56 = vpop.permute.xlu0 %899  ;;  %937 = vmatprep.subr.mxu1 %v912_v54 }
 0x2dd   : > { %v901_v57 = vsel %vm554_vm4, %v898_v55, %v900_v56  ;;  %v902_v58 = vsel %vm554_vm4, %v900_v56, %v898_v55  ;;  %938 = vmatpush1.msra.mxu1 %v911_v13 }
 0x2de   : > { %v903_v59 = vmul.f32 %v901_v57, %v1624_v29  ;;  %v904_v60 = vmul.f32 %v902_v58, %v1627_v30  ;;  %v890_v61 = vpop.permute.xlu1 %889 }
 0x2e0   : > { %v892_v62 = vpop.permute.xlu0 %891  ;;  %939 = vmatprep.subr.mxu1 %v904_v60 }
 0x2e1   : > { %v893_v45 = vsel %vm532_vm0, %v890_v61, %v892_v62  ;;  %v894_v48 = vsel %vm532_vm0, %v892_v62, %v890_v61  ;;  %940 = vmatpush1.msra.mxu1 %v903_v59  ;;  %vm919_vm0 = vcmask 588800  }
 0x2e2   : > { %v895_v4 = vmul.f32 %v893_v45, %v1593_v18  ;;  %v896_v63 = vmul.f32 %v894_v48, %v1602_v22  ;;  %v882_v5 = vpop.permute.xlu1 %881 }
 0x2e4   : > { %v884_v6 = vpop.permute.xlu0 %883  ;;  %941 = vmatprep.subr.mxu1 %v896_v63 }
 0x2e5   : > { %v885_v29 = vsel %vm510_vm2, %v882_v5, %v884_v6  ;;  %v886_v30 = vsel %vm510_vm2, %v884_v6, %v882_v5  ;;  %942 = vmatpush1.msra.mxu1 %v895_v4 }
 0x2e6   : > { %v887_v7 = vmul.f32 %v885_v29, %v1611_v25  ;;  %v888_v8 = vmul.f32 %v886_v30, %v1614_v26  ;;  %v874_v10 = vpop.permute.xlu1 %873 }
 0x2e8   : > { %v876_v12 = vpop.permute.xlu0 %875  ;;  %943 = vmatprep.subr.mxu1 %v888_v8 }
 0x2e9   : > { %v877_v18 = vsel %vm488_vm3, %v874_v10, %v876_v12  ;;  %v878_v22 = vsel %vm488_vm3, %v876_v12, %v874_v10  ;;  %944 = vmatpush1.msra.mxu1 %v887_v7 }
 0x2ea   : > { %v879_v14 = vmul.f32 %v878_v22, %v1617_v27  ;;  %v880_v15 = vmul.f32 %v877_v18, %v1620_v28  ;;  %945 = vmatprep.subr.mxu1 %v847_v47  ;;  %v866_v16 = vpop.permute.xlu1 %865 }
 0x2eb   : > { %946 = vmatpush1.msra.mxu1 %v1746_v43 }
 0x2ec   : > { %v868_v25 = vpop.permute.xlu0 %867  ;;  %947 = vmatprep.subr.mxu1 %v880_v15 }
 0x2ed   : > { %v869_v26 = vsel %vm466_vm1, %v866_v16, %v868_v25  ;;  %v870_v17 = vsel %vm466_vm1, %v868_v25, %v866_v16  ;;  %948 = vmatpush1.msra.mxu1 %v879_v14  ;;  %vm1018_vm1 = vcmask 64512  }
 0x2ee   : > { %v871_v19 = vmul.f32 %v870_v17, %v1605_v23  ;;  %v872_v20 = vmul.f32 %v869_v26, %v1608_v24  ;;  %v858_v27 = vpop.permute.xlu1 %857 }
 0x2f0   : > { %v860_v21 = vpop.permute.xlu0 %859  ;;  %949 = vmatprep.subr.mxu1 %v872_v20 }
 0x2f1   : > { %v861_v28 = vsel %vm444_vm11, %v858_v27, %v860_v21  ;;  %v862_v31 = vsel %vm444_vm11, %v860_v21, %v858_v27  ;;  %950 = vmatpush1.msra.mxu1 %v871_v19  ;;  %v1126_v19 = vld [vmem:[%s1912_s10] sm:$0xff] }
 0x2f2   : > { %v863_v33 = vmul.f32 %v862_v31, %v1681_v1  ;;  %v864_v34 = vmul.f32 %v861_v28, %v1684_v3  ;;  %v850_v35 = vpop.permute.xlu1 %849  ;;  %v848_v1 = vld [vmem:[%s1908_s6] sm:$0xff]  ;;  %v1127_v28 = vld [vmem:[%s1912_s10 + $0x8] sm:$0xff] }
 0x2f3   : > { %v1134_v21 = vld [vmem:[%s1913_s11] sm:$0xff] }
 0x2f4   : > { %v852_v36 = vpop.permute.xlu0 %851  ;;  %951 = vmatprep.subr.mxu1 %v864_v34 }
 0x2f5   : > { %v853_v23 = vsel %vm423_vm13, %v850_v35, %v852_v36  ;;  %v854_v24 = vsel %vm423_vm13, %v852_v36, %v850_v35  ;;  %952 = vmatpush1.msra.mxu1 %v863_v33  ;;  %v1135_v36 = vld [vmem:[%s1913_s11 + $0x8] sm:$0xff] }
 0x2f6   : > { %v855_v37 = vmul.f32 %v854_v24, %v1705_v38  ;;  %v856_v39 = vmul.f32 %v853_v23, %v1721_v46 }
 0x2f8   : > { %953 = vmatprep.subr.mxu1 %v856_v39 }
 0x2f9   : > { %954 = vmatpush1.msra.mxu1 %v855_v37 }
 0x2fa   : > { %1268 = vmatmul.mubr.msk.f32.vlgmr.msra.gmra.mxu1 %vm919_vm0, %v848_v1 }
 0x2ff   : > { %v917_v3 = vpop.permute.xlu1 %916 }
 0x301   : > { %v1011_v13 = vpop.permute.xlu0 %1010 }
 0x303   : > { %v1016_v60 = vpop.permute.xlu1 %1015 }
 0x3ba   : > { %v989_v40 = vpop.f32.mrf.mxu1 }
 0x3bb   : > { %v990_v41 = vadd.f32 %v989_v40, %v917_v3 }
 0x3bc   : > { %v991_v42 = vpop.f32.mrf.mxu1 }
 0x3bd   : > { %v996_v43 = vmul.f32 0.70710677, %v990_v41  ;;  %v992_v9 = vadd.f32 %v991_v42, %v917_v3  ;;  %v994_v50 = vmul.f32 0.5, %v990_v41 }
 0x3bf   : > { %1340 = verf.f32 %v996_v43  ;;  %v997_v11 = vmul.f32 0.70710677, %v992_v9  ;;  %v995_v47 = vmul.f32 0.5, %v992_v9 }
 0x3c1   : > { %1342 = verf.f32 %v997_v11 }
 0x3cc   : > { %v1341_v38 = vpop.eup %1340 }
 0x3cd   : > { %v1000_v46 = vadd.f32 1.0, %v1341_v38 }
 0x3ce   : > { %v1343_v44 = vpop.eup %1342 }
 0x3cf   : > { %v1001_v49 = vadd.f32 1.0, %v1343_v44  ;;  %v1002_v32 = vmul.f32 %v1000_v46, %v994_v50 }
 0x3d1   : > { %v1003_v0 = vmul.f32 %v1001_v49, %v995_v47 }
 0x3d3   : > { %1055 = vmatprep.subr.mxu0 %v1003_v0 }
 0x3d4   : > { %1056 = vmatpush1.msra.mxu0 %v1002_v32 }
 0x3d5   : > { %1269 = vmatmul.mubr.msk.f32.vlgmr.msra.gmra.mxu0 %vm1018_vm1, %v1004_v51 }
 0x3d6   : > { %1095 = vmatprep.mubr.f32.mxu0 %v1416_v2 }
 0x3d9   : > { %1270 = vmatmul.mubr.msk.f32.gmra.mxu0 %vm1018_vm1, %v1005_v52 }
 0x495   : > { %v1091_v53 = vpop.f32.mrf.mxu0 }
 0x496   : > { %v1092_v55 = vadd.f32 %v1091_v53, %v1011_v13 }
 0x497   : > { %v1093_v54 = vpop.f32.mrf.mxu0 }
 0x498   : > { %v1094_v56 = vadd.f32 %v1093_v54, %v1011_v13  ;;  %v1108_v48 = vmul.f32 %v1092_v55, %v1092_v55 }
 0x499   : > { %v1097_v57 = vpop.f32.mrf.mxu0 }
 0x49a   : > { %v1102_v58 = vadd.f32 %v1094_v56, %v1092_v55  ;;  %v1109_v59 = vmul.f32 %v1094_v56, %v1094_v56  ;;  %v1098_v62 = vadd.f32 %v1097_v57, %v1016_v60 }
 0x49b   : > { %v1099_v61 = vpop.f32.mrf.mxu0 }
 0x49c   : > { %v1100_v45 = vadd.f32 %v1099_v61, %v1016_v60  ;;  %1103 = vadd.xlane.f32.xlu0 %v1102_v58  ;;  %v1112_v2 = vadd.f32 %v1109_v59, %v1108_v48  ;;  %v1110_v5 = vmul.f32 %v1098_v62, %v1098_v62 }
 0x49e   : > { %v1105_v4 = vadd.f32 %v1100_v45, %v1098_v62  ;;  %v1111_v63 = vmul.f32 %v1100_v45, %v1100_v45 }
 0x4a0   : > { %1113 = vadd.xlane.f32.xlu0 %v1112_v2  ;;  %1106 = vadd.xlane.f32.xlu1 %v1105_v4  ;;  %v1115_v6 = vadd.f32 %v1111_v63, %v1110_v5 }
 0x4a4   : > { %1116 = vadd.xlane.f32.xlu0 %v1115_v6 }
 0x525   : > { %v1104_v29 = vpop.xlane.xlu0 %1103 }
 0x526   : > { %v1118_v30 = vmul.f32 0.00390625, %v1104_v29 }
 0x528   : > { %v1122_v10 = vmul.f32 %v1118_v30, %v1118_v30 }
 0x529   : > { %v1114_v7 = vpop.xlane.xlu0 %1113  ;;  %v1107_v8 = vpop.xlane.xlu1 %1106 }
 0x52a   : > { %v1120_v12 = vmul.f32 0.00390625, %v1114_v7  ;;  %v1119_v18 = vmul.f32 0.00390625, %v1107_v8 }
 0x52c   : > { %v1124_v22 = vsub.f32 %v1120_v12, %v1122_v10  ;;  %v1123_v16 = vmul.f32 %v1119_v18, %v1119_v18 }
 0x52d   : > { %v1117_v14 = vpop.xlane.xlu0 %1116 }
 0x52e   : > { %v1128_v15 = vadd.f32 1e-05, %v1124_v22  ;;  %v1121_v25 = vmul.f32 0.00390625, %v1117_v14 }
 0x530   : > { %1344 = vrsqrt.f32 %v1128_v15  ;;  %v1125_v26 = vsub.f32 %v1121_v25, %v1123_v16 }
 0x532   : > { %v1129_v17 = vadd.f32 1e-05, %v1125_v26 }
 0x534   : > { %1346 = vrsqrt.f32 %v1129_v17 }
 0x53d   : > { %v1345_v20 = vpop.eup %1344 }
 0x53e   : > { %v1132_v27 = vmul.f32 %v1345_v20, %v1126_v19 }
 0x540   : > { %1142 = vperm.xlu1 %1329, %v1132_v27   ;;  %v1136_v31 = vmul.f32 %v1132_v27, %v1118_v30 }
 0x541   : > { %v1347_v33 = vpop.eup %1346 }
 0x542   : > { %v1138_v34 = vsub.f32 %v1134_v21, %v1136_v31  ;;  %v1133_v35 = vmul.f32 %v1347_v33, %v1127_v28 }
 0x544   : > { %1156 = vperm.xlu1 %1329, %v1138_v34   ;;  %1147 = vperm.xlu0 %1328, %v1133_v35   ;;  %v1137_v23 = vmul.f32 %v1133_v35, %v1119_v18 }
 0x546   : > { %v1139_v24 = vsub.f32 %v1135_v36, %v1137_v23 }
 0x548   : > { %1161 = vperm.xlu1 %1329, %v1139_v24  }
 0x5bb   : > { %v1143_v37 = vpop.permute.xlu1 %1142 }
 0x5bc   : > { %v1150_v39 = vmul.f32 %v1143_v37, %v1092_v55  ;;  %v1151_v1 = vmul.f32 %v1143_v37, %v1094_v56 }
 0x5bf   : > { %v1148_v3 = vpop.permute.xlu0 %1147  ;;  %v1157_v40 = vpop.permute.xlu1 %1156 }
 0x5c0   : > { %v1164_v41 = vadd.f32 %v1157_v40, %v1150_v39  ;;  %v1165_v42 = vadd.f32 %v1157_v40, %v1151_v1  ;;  %v1152_v43 = vmul.f32 %v1148_v3, %v1098_v62  ;;  %v1153_v9 = vmul.f32 %v1148_v3, %v1100_v45 }
 0x5c2   : > { %1168 = vst [vmem:[%s406_s16] sm:$0xff] %v1164_v41  ;;  %1169 = vst [vmem:[%s406_s16 + $0x8] sm:$0xff] %v1165_v42 }
 0x5c3   : > { %v1162_v11 = vpop.permute.xlu1 %1161 }
 0x5c4   : > { %v1166_v38 = vadd.f32 %v1162_v11, %v1152_v43  ;;  %v1167_v44 = vadd.f32 %v1162_v11, %v1153_v9 }
 0x5c6   : > { %1170 = vst [vmem:[%s406_s16 + $0x10] sm:$0xff] %v1166_v38  ;;  %1171 = vst [vmem:[%s406_s16 + $0x18] sm:$0xff] %v1167_v44 }
 0x5c7   : > { %1361 = shalt.err (!%p1358_p3)
}
 0x5c8   : > { %s1362_s29 = scalar_lea.hbm %s1859_s19, 512  ;;  %s1366_s0 = scalar_lea.hbm %s1914_s12, 1024 }
 0x5c9   : > { %p1363_p4 = scmp.ne.s32.totalorder %s1859_s19, %s1362_s29  ;;  %p1367_p9 = scmp.lt.s32.totalorder %s1859_s19, %s1914_s12 }
 0x5ca   : > { %p1368_p10 = scmp.lt.s32.totalorder %s1366_s0, %s1362_s29 }
 0x5cb   : > { %p1364_p7 = pnand %p1363_p4, %p1525_p5 }
 0x5cc   : > { %p1369_p11 = por %p1368_p10, %p1367_p9 }
 0x5cd   : > { %p1365_p8 = pneg %p1364_p7 }
 0x5cf   : > { %p1370_p12 = pnand %p1369_p11, %p1365_p8 }
 0x5d1   : > { %1373 = shalt.err (!%p1370_p12)
}
 0x5d2   : > { %s1421_s1 = smov 256  }
 0x5d3   : > { %1278 = dma.vmem_to_hbm [thread:$0]  (%p1525_p5), %s1854_s15, 512, %s1859_s19, %s1861_s25, %s1421_s1, %s1421_s1, %s1942_s20  }
 0x5d4 PF: > { %p1284_p13 = scmp.ge.s32.totalorder %s1408_s24, 2  ;;  %s1201_s2 = sand.u32 1, %s1396_s21  }
 0x5d5   : > { %s1202_s26 = scalar_lea.sflag [#allocation3], %s1201_s2 }
 0x5d6   : > { %p1281_p0 = pnand %p1284_p13, %p1529_p6 }
 0x5d8   : > { %p1282_p1 = pneg %p1281_p0 }
 0x5da   : > { %1391 = dma.done.wait (%p1282_p1), %s1202_s26, 512  }
 0x5db   : > { %1393 = vsyncadd (%p1282_p1), %s1202_s26, 4294966784  ;;  %p22_p2 = scmp.ge.s32.totalorder %s1512_s27, 4   ;;  %s1944_s21 = smov %s1400_s22 }
 0x5dc   : > { %s1945_s22 = smov %s1404_s23  ;;  %s1946_s23 = smov %s1523_s30 }
 0x5dd   : > { %s1947_s24 = smov %s1512_s27  ;;  %24 = sbr.rel (!%p22_p2) target bundleno = 7 (0x7), region = 110 }
 0x5e2   :  { %1207 = vsyncpa [#allocation3], 1 }
 0x5e3   :  { %1209 = vsyncpa [#allocation3 + $0x1], 1 }

</bundles_post_ra>
